<compile_context>
chip_gen: v7x
topology: tpu7x:2x2x1
jax: 0.10.0
libtpu: 0.0.40
codegen_flags: <defaults>
</compile_context>

<pallas_src>
import functools

import jax
import jax.numpy as jnp
from jax.experimental import pallas as pl
from jax.experimental.pallas import tpu as pltpu


def _custom_loss_kernel(x_ref, out_ref, *, inv_n_lm_half):
    # x_ref: (8, W) f32 packed slab (see wrapper).
    x = x_ref[...].astype(jnp.float32)

    # --- MSE / 2 on landmarks (rows 0 and 1) ---
    diff = x[0:1, :] - x[1:2, :]
    euclid_loss = jnp.sum(diff * diff) * inv_n_lm_half  # (sum/N) * 0.5, N static

    # --- grouped-of-3 CrossEntropy with probability targets ---
    # rows 2..4 = logits (3 classes on sublanes, groups on lanes)
    # rows 5..7 = probability targets
    vp = x[2:5, :]
    vt = x[5:8, :]
    m = jnp.max(vp, axis=0, keepdims=True)              # (1, W) sublane reduce
    z = vp - m
    lse = jnp.log(jnp.sum(jnp.exp(z), axis=0, keepdims=True))
    logp = z - lse                                       # log_softmax over class axis
    cel_loss = -jnp.sum(vt * logp)                       # summed over all groups

    # TODO(synk): torch.sum(euclid_loss, cel_loss) in the PyTorch reference is not a
    # valid reduction call; implemented as scalar addition of the two losses.
    out_ref[0] = (euclid_loss + cel_loss).astype(out_ref.dtype)


def custom_loss(landmarks_pred, vis_pred, landmarks_target, vis_target):
    """Pallas equivalent of CustomLoss.forward((landmarks_pred, vis_pred),
    (landmarks_target, vis_target)). Returns a float32 scalar."""
    # Replicate the .view(1, -1) reshapes + group-of-3 slicing, then pack all
    # four operands into one lane-dense (8, W) slab -> a single input DMA.
    lm_pred = landmarks_pred.reshape(1, -1).astype(jnp.float32)
    lm_tgt = landmarks_target.reshape(1, -1).astype(jnp.float32)
    assert lm_pred.shape == lm_tgt.shape, "landmark shapes must match after view(1,-1)"
    n_lm = lm_pred.shape[1]

    vp_flat = vis_pred.reshape(-1).astype(jnp.float32)
    vt_flat = vis_target.reshape(-1).astype(jnp.float32)
    c = vt_flat.shape[0]
    assert c % 3 == 0 and vp_flat.shape[0] == c, "visibility length must be a multiple of 3"
    g = c // 3
    vp = vp_flat.reshape(g, 3).T                         # (3, G) class axis on sublanes
    vt = vt_flat.reshape(g, 3).T                         # (3, G)

    w = max(n_lm, g)

    def _pad(a):
        return jnp.pad(a, ((0, 0), (0, w - a.shape[1])))

    # (8, W): rows 0-1 landmarks pred/target, rows 2-4 vis logits, rows 5-7 vis targets.
    packed = jnp.concatenate([_pad(lm_pred), _pad(lm_tgt), _pad(vp), _pad(vt)], axis=0)

    kernel = functools.partial(_custom_loss_kernel, inv_n_lm_half=0.5 / float(n_lm))
    out = pl.pallas_call(
        kernel,
        out_shape=jax.ShapeDtypeStruct((1,), jnp.float32),
        in_specs=[pl.BlockSpec(memory_space=pltpu.MemorySpace.VMEM)],
        out_specs=pl.BlockSpec(memory_space=pltpu.MemorySpace.SMEM),
    )(packed)
    return out[0]


def _reference_loss(landmarks_pred, vis_pred, landmarks_target, vis_target):
    """Pure-JAX reference mirroring the PyTorch semantics."""
    lm_pred = landmarks_pred.reshape(1, -1)
    lm_tgt = landmarks_target.reshape(1, -1)
    euclid = jnp.mean((lm_pred - lm_tgt) ** 2) / 2.0
    vp = vis_pred.reshape(-1, 3)
    vt = vis_target.reshape(-1, 3)
    logp = jax.nn.log_softmax(vp, axis=-1)
    cel = -jnp.sum(vt * logp)
    return euclid + cel


if __name__ == "__main__":
    key = jax.random.PRNGKey(0)
    k1, k2, k3, k4 = jax.random.split(key, 4)

    n_landmarks = 8
    # predictions come out flat (1, 2*n) / (1, 3*n); targets come in (n, 2) / (n, 3)
    landmarks_pred = jax.random.normal(k1, (1, 2 * n_landmarks), dtype=jnp.float32)
    landmarks_target = jax.random.normal(k2, (n_landmarks, 2), dtype=jnp.float32)

    vis_pred = jax.random.normal(k3, (1, 3 * n_landmarks), dtype=jnp.float32)
    # probability targets per group of 3 visibility classes
    vis_target = jax.nn.softmax(
        jax.random.normal(k4, (n_landmarks, 3), dtype=jnp.float32), axis=-1
    )

    loss = custom_loss(landmarks_pred, vis_pred, landmarks_target, vis_target)
    loss = jax.block_until_ready(loss)

    ref = _reference_loss(landmarks_pred, vis_pred, landmarks_target, vis_target)
    assert jnp.allclose(loss, ref, rtol=1e-5, atol=1e-5), (loss, ref)

    print("KERNEL_OK")
</pallas_src>

<mosaic_0001>
module attributes {stable_mosaic.version = 11 : i64} {
  func.func @_custom_loss_kernel(%arg0: memref<8x16xf32, #tpu.memory_space<vmem>>, %arg1: memref<1xf32, #tpu.memory_space<smem>>) attributes {dimension_semantics = [], scalar_prefetch = 0 : i64, scratch_operands = 0 : i64, tpu.core_type = #tpu.core_type<tc>} {
    %c0 = arith.constant 0 : index
    %c0_0 = arith.constant 0 : index
    %0 = vector.load %arg0[%c0, %c0_0] : memref<8x16xf32, #tpu.memory_space<vmem>>, vector<8x16xf32>
    %1 = vector.extract_strided_slice %0 {offsets = [0, 0], sizes = [1, 16], strides = [1, 1]} : vector<8x16xf32> to vector<1x16xf32>
    %2 = vector.extract_strided_slice %0 {offsets = [1, 0], sizes = [1, 16], strides = [1, 1]} : vector<8x16xf32> to vector<1x16xf32>
    %3 = arith.subf %1, %2 : vector<1x16xf32>
    %4 = arith.mulf %3, %3 : vector<1x16xf32>
    %5 = vector.shape_cast %4 : vector<1x16xf32> to vector<1x1x16xf32>
    %cst = arith.constant dense<0.000000e+00> : vector<1xf32>
    %6 = vector.multi_reduction <add>, %5, %cst [1, 2] : vector<1x1x16xf32> to vector<1xf32>
    %7 = vector.shape_cast %6 : vector<1xf32> to vector<1x1x1xf32>
    %8 = vector.extract %7[0, 0, 0] : f32 from vector<1x1x1xf32>
    %cst_1 = arith.constant 3.125000e-02 : f32
    %9 = arith.mulf %8, %cst_1 : f32
    %10 = vector.extract_strided_slice %0 {offsets = [2, 0], sizes = [3, 16], strides = [1, 1]} : vector<8x16xf32> to vector<3x16xf32>
    %11 = vector.extract_strided_slice %0 {offsets = [5, 0], sizes = [3, 16], strides = [1, 1]} : vector<8x16xf32> to vector<3x16xf32>
    %cst_2 = arith.constant dense<0xFF800000> : vector<16xf32>
    %12 = vector.multi_reduction <maximumf>, %10, %cst_2 [0] : vector<3x16xf32> to vector<16xf32>
    %13 = vector.shape_cast %12 : vector<16xf32> to vector<1x16xf32>
    %14 = vector.broadcast %13 : vector<1x16xf32> to vector<3x16xf32>
    %15 = arith.subf %10, %14 : vector<3x16xf32>
    %16 = math.exp %15 : vector<3x16xf32>
    %cst_3 = arith.constant dense<0.000000e+00> : vector<16xf32>
    %17 = vector.multi_reduction <add>, %16, %cst_3 [0] : vector<3x16xf32> to vector<16xf32>
    %18 = vector.shape_cast %17 : vector<16xf32> to vector<1x16xf32>
    %19 = math.log %18 : vector<1x16xf32>
    %20 = vector.broadcast %19 : vector<1x16xf32> to vector<3x16xf32>
    %21 = arith.subf %15, %20 : vector<3x16xf32>
    %22 = arith.mulf %11, %21 : vector<3x16xf32>
    %23 = vector.shape_cast %22 : vector<3x16xf32> to vector<1x3x16xf32>
    %cst_4 = arith.constant dense<0.000000e+00> : vector<1xf32>
    %24 = vector.multi_reduction <add>, %23, %cst_4 [1, 2] : vector<1x3x16xf32> to vector<1xf32>
    %25 = vector.shape_cast %24 : vector<1xf32> to vector<1x1x1xf32>
    %26 = vector.extract %25[0, 0, 0] : f32 from vector<1x1x1xf32>
    %cst_5 = arith.constant 0.000000e+00 : f32
    %27 = arith.subf %cst_5, %26 : f32
    %28 = arith.addf %9, %27 : f32
    %c0_6 = arith.constant 0 : index
    %29 = memref.load %arg1[%c0_6] : memref<1xf32, #tpu.memory_space<smem>>
    memref.store %28, %arg1[%c0_6] : memref<1xf32, #tpu.memory_space<smem>>
    return
  }
}

</mosaic_0001>

<bundles_post_ra>
// kernel: tpu_custom_call.1
= control target key start
LH: loop header
LB: loop body
LE: loop exit
PB: predicated region body
PF: predicated region fallthrough
CT: control target
= control target key end

     0   :  { %6 = vsyncpa [#allocation3], 0  ;;  %s183_s0 = inlined_call_operand.hbm [shape: f32[8,16], index: 0, kind: input, shape index: {}]   ;;  %s184_s1 = inlined_call_operand.hbm [shape: f32[1], index: 1, kind: output, shape index: {}]  }
   0x1   :  { %7 = vsyncpa [#allocation4], 0  ;;  %s145_s6 = smov [#allocation2]   ;;  %s109_s10 = scalar_lea.hbm %s183_s0, 128 }
   0x2   :  { %s14_s7 = sshll.u32 %s145_s6, 4  ;;  %p110_p0 = scmp.ne.s32.totalorder %s183_s0, %s109_s10  ;;  %s15_s7 = int_to_ptr.vmem [resolvable:$true] %s14_s7 }
   0x3   :  { %p113_p1 = scmp.lt.u32.totalorder %s109_s10, %s183_s0 }
   0x5   :  { %p115_p2 = pnand %p113_p1, %p110_p0 }
   0x7   :  { %118 = shalt.err (!%p115_p2)
}
   0x8   :  { %s119_s15 = scalar_lea.vmem %s15_s7, 128  ;;  %p124_p4 = scmp.lt.s32.totalorder %s15_s7, %s15_s7 }
   0x9   :  { %p120_p3 = scmp.ne.s32.totalorder %s15_s7, %s119_s15  ;;  %p125_p5 = scmp.lt.s32.totalorder %s119_s15, %s119_s15 }
   0xb   :  { %p126_p6 = por %p125_p5, %p124_p4 }
   0xd   :  { %p127_p7 = pnand %p126_p6, %p120_p3 }
   0xf   :  { %130 = shalt.err (!%p127_p7)
}
  0x10   :  { %17 = dma.hbm_to_vmem [thread:$0]  %s183_s0, 128, %s15_s7, [#allocation3]  }
  0x11   :  { %141 = dma.done.wait [#allocation3], 128  }
  0x12   :  { %142 = vsyncadd [#allocation3], 4294967168  ;;  %vm39_vm0 = vcmask 126978   ;;  %v21_v0 = vld [vmem:[#allocation2] sm:$0xff]  ;;  %vm27_vm1 = vcmask 122880   ;;  %vm53_vm2 = vcmask 124928  }
  0x13   :  { %v23_v1 = vrot.slane %v21_v0, 1  ;;  %v40_v2 = vsel %vm39_vm0, %v21_v0, -inf  ;;  %s131_s24 = scalar_lea.hbm %s184_s1, 16 }
  0x14   :  { %v41_v3 = vrot.slane %v40_v2, 4  ;;  %p132_p8 = scmp.ne.s32.totalorder %s184_s1, %s131_s24  ;;  %p135_p9 = scmp.lt.u32.totalorder %s131_s24, %s184_s1 }
  0x15   :  { %v25_v4 = vsub.f32 %v21_v0, %v23_v1 }
  0x16   :  { %v42_v5 = vmax.f32 %v40_v2, %v41_v3  ;;  %p137_p10 = pnand %p135_p9, %p132_p8 }
  0x17   :  { %v26_v6 = vmul.f32 %v25_v4, %v25_v4 }
  0x18   :  { %v43_v7 = vrot.slane %v42_v5, 2 }
  0x19   :  { %v28_v8 = vsel %vm27_vm1, %v26_v6, 0.0 }
  0x1a   :  { %29 = vadd.xlane.f32.xlu0 %v28_v8  ;;  %v44_v9 = vmax.f32 %v42_v5, %v43_v7 }
  0x1c   :  { %v45_v10 = vrot.slane %v44_v9, 1 }
  0x1e   :  { %v46_v11 = vmax.f32 %v44_v9, %v45_v10 }
  0x20   :  { %v47_v12 = vsub.f32 %v21_v0, %v46_v11 }
  0x22   :  { %v48_v13 = vmul.f32 1.442695, %v47_v12 }
  0x24   :  { %105 = vpow2.f32 %v48_v13 }
  0x2e   :  { %v106_v14 = vpop.eup %105 }
  0x2f   :  { %v51_v15 = vrot.slane %v106_v14, 2 }
  0x31   :  { %v54_v16 = vsel %vm53_vm2, %v51_v15, 0.0 }
  0x32   :  { %v55_v17 = vrot.slane %v54_v16, 4 }
  0x34   :  { %v56_v18 = vadd.f32 %v55_v17, %v54_v16 }
  0x36   :  { %v57_v19 = vrot.slane %v56_v18, 2 }
  0x38   :  { %v58_v20 = vadd.f32 %v57_v19, %v56_v18 }
  0x3a   :  { %v59_v21 = vrot.slane %v58_v20, 1 }
  0x3c   :  { %v60_v22 = vadd.f32 %v59_v21, %v58_v20 }
  0x3e   :  { %107 = vlog2.f32 %v60_v22 }
  0x48   :  { %v108_v23 = vpop.eup %107 }
  0x49   :  { %v62_v24 = vmul.f32 0.6931472, %v108_v23 }
  0x4b   :  { %v63_v25 = vsub.f32 %v47_v12, %v62_v24 }
  0x4d   :  { %v65_v26 = vrot.slane %v63_v25, 5 }
  0x4f   :  { %v67_v27 = vmul.f32 %v65_v26, %v21_v0 }
  0x51   :  { %v69_v28 = vrot.slane %v67_v27, 5 }
  0x53   :  { %v71_v29 = vsel %vm53_vm2, %v69_v28, 0.0 }
  0x54   :  { %72 = vadd.xlane.f32.xlu0 %v71_v29 }
  0xa7   :  { %v30_v30 = vpop.xlane.xlu0 %29 }
  0xa8   :  { %v31_v31 = vrot.slane %v30_v30, 4 }
  0xaa   :  { %v32_v32 = vadd.f32 %v31_v31, %v30_v30 }
  0xac   :  { %v33_v33 = vrot.slane %v32_v32, 2 }
  0xae   :  { %v34_v34 = vadd.f32 %v33_v33, %v32_v32 }
  0xb0   :  { %v35_v35 = vrot.slane %v34_v34, 1 }
  0xb2   :  { %v36_v36 = vadd.f32 %v35_v35, %v34_v34 }
  0xb4   :  { %99 = vpush %v36_v36 }
  0xe1   :  { %v73_v37 = vpop.xlane.xlu0 %72 }
  0xe2   :  { %v74_v38 = vrot.slane %v73_v37, 4 }
  0xe4   :  { %v75_v39 = vadd.f32 %v74_v38, %v73_v37 }
  0xe5   :  { %s100_s0 = spop %99 }
  0xe6   :  { %v76_v40 = vrot.slane %v75_v39, 2  ;;  %s38_s19 = smul.f32 0.03125, %s100_s0 }
  0xe8   :  { %v77_v41 = vadd.f32 %v76_v40, %v75_v39 }
  0xea   :  { %v78_v42 = vrot.slane %v77_v41, 1 }
  0xec   :  { %v79_v43 = vadd.f32 %v78_v42, %v77_v41 }
  0xee   :  { %101 = vpush %v79_v43 }
 0x11f   :  { %s102_s18 = spop %101 }
 0x120   :  { %s81_s20 = ssub.f32 0.0, %s102_s18 }
 0x122   :  { %s82_s21 = sadd.f32 %s81_s20, %s38_s19 }
 0x124   :  { %84 = sst [smem:[#allocation5]] %s82_s21 }
 0x125   :  { %140 = shalt.err (!%p137_p10)
}
 0x126   :  { %s146_s29 = smov [#allocation5]  }
 0x127   :  { %92 = dma.smem_to_hbm %s146_s29, 16, %s184_s1, [#allocation4]  }
 0x128   :  { %143 = dma.done.wait [#allocation4], 16  }
 0x129   :  { %144 = vsyncadd [#allocation4], 4294967280 }
 0x12a   :  { %96 = sfence }
 0x12b   :  { %97 = vsyncpa [#allocation3], 1 }
 0x12c   :  { %98 = vsyncpa [#allocation4], 1 }

</bundles_post_ra>
